<compile_context>
chip_gen: v5e
topology: v5e:2x2
jax: 0.10.0
libtpu: 0.0.40
codegen_flags: <defaults>
</compile_context>

<pallas_src>
import functools
import math

import jax
import jax.numpy as jnp
from jax import lax
from jax.experimental import pallas as pl
from jax.experimental.pallas import tpu as pltpu


_ONEHOT_MAX_VOCAB = 512            # past this, one-hot lookup becomes MXU-bound
_ONEHOT_TOK_BLOCK = 512            # keeps the (T, V) one-hot temp <= 512 KiB bf16
_GATHER_MAX_TOK_BLOCK = 2048
_GATHER_TARGET_TILE_BYTES = 1 << 20  # >= 1 MiB output tiles (amortize grid steps)
_GATHER_WINDOW = 16                # in-flight row DMAs (power of two)


def _round_up(x, m):
    return (x + m - 1) // m * m


@functools.lru_cache(maxsize=None)
def _vmem_limit_bytes():
    """Generation-aware VMEM limit (v7x only has 64 MiB physical VMEM)."""
    try:
        cap = int(pltpu.get_tpu_info().vmem_capacity_bytes)
    except Exception:  # conservative fallback (older jax / no device query)
        cap = 64 * 1024 * 1024
    return max(32 * 1024 * 1024, min(int(0.75 * cap), 96 * 1024 * 1024))


# --------------------------------------------------------------------------
# Small-vocab path: resident table + one-hot bf16 MXU matmul.
# --------------------------------------------------------------------------
def _onehot_hi_lo_kernel(ids_ref, t_hi_ref, t_lo_ref, out_ref, *, scale):
    """f32 tables: rows = onehot@hi(bf16) + onehot@lo(bf16)  (~f32-accurate)."""
    vocab = t_hi_ref.shape[0]
    tok_block = ids_ref.shape[0]
    ids = jnp.clip(ids_ref[...], 0, vocab - 1)                    # (T, 1) int32
    col = lax.broadcasted_iota(jnp.int32, (tok_block, vocab), 1)  # (T, V)
    onehot = (ids == col).astype(jnp.bfloat16)                    # 0/1 exact in bf16
    rows = (jnp.dot(onehot, t_hi_ref[...], preferred_element_type=jnp.float32)
            + jnp.dot(onehot, t_lo_ref[...], preferred_element_type=jnp.float32))
    out_ref[...] = (rows * scale).astype(out_ref.dtype)


def _onehot_single_kernel(ids_ref, table_ref, out_ref, *, scale):
    """bf16 (or other narrow) tables: a single native-dtype MXU matmul."""
    vocab = table_ref.shape[0]
    tok_block = ids_ref.shape[0]
    ids = jnp.clip(ids_ref[...], 0, vocab - 1)
    col = lax.broadcasted_iota(jnp.int32, (tok_block, vocab), 1)
    onehot = (ids == col).astype(table_ref.dtype)
    rows = jnp.dot(onehot, table_ref[...], preferred_element_type=jnp.float32)
    out_ref[...] = (rows * scale).astype(out_ref.dtype)


def _embed_small_vocab(flat_ids, tables, tok_block, scale, out_dtype):
    n_pad = flat_ids.shape[0]
    vocab, emb = tables[0].shape
    n_blocks = n_pad // tok_block
    kernel = functools.partial(
        _onehot_hi_lo_kernel if len(tables) == 2 else _onehot_single_kernel,
        scale=scale)
    ids_col = flat_ids.reshape(n_pad, 1)

    def run(single_buffer_table):
        # Resident (never-refetched) tables only need a single VMEM buffer.
        extra = {"pipeline_mode": pl.Buffered(1)} if single_buffer_table else {}
        table_specs = [pl.BlockSpec((vocab, emb), lambda i: (0, 0), **extra)
                       for _ in tables]
        return pl.pallas_call(
            kernel,
            out_shape=jax.ShapeDtypeStruct((n_pad, emb), out_dtype),
            grid_spec=pltpu.PrefetchScalarGridSpec(
                num_scalar_prefetch=0,
                grid=(n_blocks,),
                in_specs=[pl.BlockSpec((tok_block, 1), lambda i: (i, 0))]
                + table_specs,
                out_specs=pl.BlockSpec((tok_block, emb), lambda i: (i, 0)),
            ),
            compiler_params=pltpu.CompilerParams(
                dimension_semantics=("parallel",),
                vmem_limit_bytes=_vmem_limit_bytes(),
            ),
        )(ids_col, *tables)

    try:
        return run(single_buffer_table=True)
    except Exception:  # graceful fallback if Buffered(1) is unavailable
        return run(single_buffer_table=False)


# --------------------------------------------------------------------------
# Large-vocab path: rolling-window row DMAs from HBM straight into out_ref.
# --------------------------------------------------------------------------
def _embed_gather_kernel(ids_ref, table_ref, out_ref, sems, *,
                         scale, tok_block, vocab):
    base = pl.program_id(0) * tok_block
    n_ids = ids_ref.shape[0]

    def start_row(row, tok, slot):
        pltpu.make_async_copy(
            table_ref.at[pl.ds(tok, 1), :],
            out_ref.at[pl.ds(row, 1), :],
            sems.at[slot]).start()

    # Prime the window of in-flight row gathers.
    n_prime = min(_GATHER_WINDOW, tok_block)
    for t in range(n_prime):
        start_row(t, jnp.clip(ids_ref[base + t], 0, vocab - 1), t)

    def steady(t, carry):
        slot = t & (_GATHER_WINDOW - 1)
        nxt = t + _GATHER_WINDOW
        # Read the refill row's id from SMEM *before* the wait (.wait() breaks
        # SMEM store->load forwarding and would stall this scalar read).
        tok_nxt = jnp.clip(ids_ref[jnp.minimum(base + nxt, n_ids - 1)],
                           0, vocab - 1)
        # Wait for row t.  Only the transfer size matters for the wait, so use
        # a static descriptor instead of re-deriving the dynamic slices.
        pltpu.make_async_copy(table_ref.at[pl.ds(0, 1), :],
                              out_ref.at[pl.ds(0, 1), :],
                              sems.at[slot]).wait()

        @pl.when(nxt < tok_block)
        def _():
            start_row(nxt, tok_nxt, slot)

        return carry

    lax.fori_loop(0, tok_block, steady, 0)

    # Every row has been waited on above; scale the landed tile in place.
    out_ref[...] = (out_ref[...].astype(jnp.float32) * scale).astype(out_ref.dtype)


def _embed_gather(flat_ids, table, tok_block, scale):
    n_pad = flat_ids.shape[0]
    vocab, emb = table.shape
    n_blocks = n_pad // tok_block
    kernel = functools.partial(_embed_gather_kernel, scale=scale,
                               tok_block=tok_block, vocab=vocab)
    # TODO(synk): for very long sequences, chunk the scalar-prefetched id array
    # (1-D SMEM arrays pad to next_pow2(4N) bytes) or move ids to a blocked
    # SMEM in_spec; fine at these sizes.
    return pl.pallas_call(
        kernel,
        out_shape=jax.ShapeDtypeStruct((n_pad, emb), table.dtype),
        grid_spec=pltpu.PrefetchScalarGridSpec(
            num_scalar_prefetch=1,                         # token ids -> SMEM
            grid=(n_blocks,),
            in_specs=[pl.BlockSpec(memory_space=pl.ANY)],  # table stays in HBM
            out_specs=pl.BlockSpec((tok_block, emb), lambda i, ids: (i, 0)),
            scratch_shapes=[pltpu.SemaphoreType.DMA((_GATHER_WINDOW,))],
        ),
        compiler_params=pltpu.CompilerParams(
            dimension_semantics=("parallel",),
            vmem_limit_bytes=_vmem_limit_bytes(),
        ),
    )(flat_ids, table)


# --------------------------------------------------------------------------
# Public wrapper: emb_table[tokens] * sqrt(emb_size)
# --------------------------------------------------------------------------
def token_embedding(tokens, emb_table, *, onehot_max_vocab=_ONEHOT_MAX_VOCAB):
    """Forward of TokenEmbedding: emb_table[tokens] * sqrt(emb_size)."""
    lead_shape = tokens.shape
    vocab, emb = emb_table.shape
    n_tok = int(math.prod(lead_shape)) if lead_shape else 1
    flat_ids = tokens.reshape(n_tok).astype(jnp.int32)
    scale = float(math.sqrt(emb))          # sqrt of the *unpadded* emb_size
    out_dtype = emb_table.dtype

    # Lane-dense outputs: pad the embedding dim to a multiple of 128 so output
    # stores are unmasked vst; pad columns are sliced off at the end.
    emb_pad = _round_up(emb, 128)
    table = emb_table if emb_pad == emb else jnp.pad(
        emb_table, ((0, 0), (0, emb_pad - emb)))

    use_onehot = vocab <= onehot_max_vocab

    # Token block: sublane-dense, big enough to amortize the ~0.35us grid-step
    # overhead, but never padded far past the real token count.
    if use_onehot:
        ideal = _ONEHOT_TOK_BLOCK
    else:
        row_bytes = emb_pad * jnp.dtype(out_dtype).itemsize
        ideal = min(_GATHER_MAX_TOK_BLOCK,
                    max(8, (_GATHER_TARGET_TILE_BYTES // row_bytes) // 8 * 8))
    tok_block = max(8, min(ideal, _round_up(n_tok, 8)))
    n_pad = _round_up(n_tok, tok_block)
    if n_pad != n_tok:
        flat_ids = jnp.concatenate(
            [flat_ids, jnp.zeros((n_pad - n_tok,), jnp.int32)])

    if use_onehot:
        if table.dtype == jnp.float32:
            # Split ONCE here (not per grid step): hi + lo carry ~16 significand
            # bits and both matmuls run on the native bf16 MXU path.
            t_hi = table.astype(jnp.bfloat16)
            t_lo = (table - t_hi.astype(jnp.float32)).astype(jnp.bfloat16)
            tables = (t_hi, t_lo)
        else:
            tables = (table,)
        out_flat = _embed_small_vocab(flat_ids, tables, tok_block, scale,
                                      out_dtype)
    else:
        out_flat = _embed_gather(flat_ids, table, tok_block, scale)

    return out_flat[:n_tok, :emb].reshape(*lead_shape, emb)


if __name__ == "__main__":
    vocab_size = 64
    emb_size = 128   # lane-dense (multiple of 128)
    batch, seq = 2, 8

    key = jax.random.PRNGKey(0)
    k_w, k_t = jax.random.split(key)

    # Deterministic "parameters" for nn.Embedding(vocab_size, emb_size).
    emb_table = jax.random.normal(k_w, (vocab_size, emb_size), dtype=jnp.float32)
    tokens = jax.random.randint(k_t, (batch, seq), 0, vocab_size, dtype=jnp.int32)

    ref = emb_table[tokens] * math.sqrt(emb_size)

    # Small-vocab path: resident hi/lo bf16 tables, one-hot MXU lookup.
    out = jax.block_until_ready(token_embedding(tokens, emb_table))
    assert out.shape == (batch, seq, emb_size)
    assert jnp.allclose(out, ref, atol=1e-5, rtol=1e-5)

    # Large-vocab path (forced): rolling-window row-DMA gather from HBM.
    out_g = jax.block_until_ready(
        token_embedding(tokens, emb_table, onehot_max_vocab=0))
    assert out_g.shape == (batch, seq, emb_size)
    assert jnp.allclose(out_g, ref, atol=1e-5, rtol=1e-5)

    print("KERNEL_OK")
</pallas_src>

<mosaic_0001>
module attributes {stable_mosaic.version = 11 : i64} {
  func.func @_onehot_hi_lo_kernel(%arg0: i32, %arg1: memref<16x1xi32, #tpu.memory_space<vmem>>, %arg2: memref<64x128xbf16, #tpu.memory_space<vmem>>, %arg3: memref<64x128xbf16, #tpu.memory_space<vmem>>, %arg4: memref<16x128xf32, #tpu.memory_space<vmem>>) attributes {dimension_semantics = [#tpu.dimension_semantics<parallel>], iteration_bounds = array<i64: 1>, scalar_prefetch = 0 : i64, scratch_operands = 0 : i64, tpu.core_type = #tpu.core_type<tc>, window_params = [{transform_indices = @transform_0, window_bounds = array<i64: 16, 1>}, {pipeline_mode = #tpu.pipeline_mode<synchronous>, transform_indices = @transform_1, window_bounds = array<i64: 64, 128>}, {pipeline_mode = #tpu.pipeline_mode<synchronous>, transform_indices = @transform_2, window_bounds = array<i64: 64, 128>}, {transform_indices = @transform_3, window_bounds = array<i64: 16, 128>}]} {
    %c0 = arith.constant 0 : index
    %c0_0 = arith.constant 0 : index
    %0 = vector.load %arg1[%c0, %c0_0] : memref<16x1xi32, #tpu.memory_space<vmem>>, vector<16x1xi32>
    %c0_i32 = arith.constant 0 : i32
    %c63_i32 = arith.constant 63 : i32
    %1 = vector.broadcast %c0_i32 : i32 to vector<16x1xi32>
    %2 = arith.maxsi %1, %0 : vector<16x1xi32>
    %3 = vector.broadcast %c63_i32 : i32 to vector<16x1xi32>
    %4 = arith.minsi %3, %2 : vector<16x1xi32>
    %5 = tpu.iota {dimensions = array<i32: 1>} : vector<16x64xi32>
    %6 = vector.broadcast %4 : vector<16x1xi32> to vector<16x64xi32>
    %7 = arith.cmpi eq, %6, %5 : vector<16x64xi32>
    %8 = arith.extui %7 : vector<16x64xi1> to vector<16x64xi32>
    %9 = arith.sitofp %8 : vector<16x64xi32> to vector<16x64xf32>
    %10 = arith.truncf %9 : vector<16x64xf32> to vector<16x64xbf16>
    %c0_1 = arith.constant 0 : index
    %c0_2 = arith.constant 0 : index
    %11 = vector.load %arg2[%c0_1, %c0_2] : memref<64x128xbf16, #tpu.memory_space<vmem>>, vector<64x128xbf16>
    %cst = arith.constant dense<0.000000e+00> : vector<16x128xf32>
    %12 = tpu.matmul %10, %11, %cst {dimension_numbers = #tpu.dot_dimension_numbers<[1], [0], [0], [1], [0, 0, 1, 1], [], []>} : vector<16x64xbf16>, vector<64x128xbf16>, vector<16x128xf32> -> vector<16x128xf32>
    %c0_3 = arith.constant 0 : index
    %c0_4 = arith.constant 0 : index
    %13 = vector.load %arg3[%c0_3, %c0_4] : memref<64x128xbf16, #tpu.memory_space<vmem>>, vector<64x128xbf16>
    %cst_5 = arith.constant dense<0.000000e+00> : vector<16x128xf32>
    %14 = tpu.matmul %10, %13, %cst_5 {dimension_numbers = #tpu.dot_dimension_numbers<[1], [0], [0], [1], [0, 0, 1, 1], [], []>} : vector<16x64xbf16>, vector<64x128xbf16>, vector<16x128xf32> -> vector<16x128xf32>
    %15 = arith.addf %12, %14 : vector<16x128xf32>
    %cst_6 = arith.constant 11.3137083 : f32
    %16 = vector.broadcast %cst_6 : f32 to vector<16x128xf32>
    %17 = arith.mulf %15, %16 : vector<16x128xf32>
    %c0_7 = arith.constant 0 : index
    %c0_8 = arith.constant 0 : index
    %18 = vector.load %arg4[%c0_7, %c0_8] : memref<16x128xf32, #tpu.memory_space<vmem>>, vector<16x128xf32>
    tpu.vector_store %arg4[%c0_7, %c0_8], %17 {strides = array<i32>} : memref<16x128xf32, #tpu.memory_space<vmem>>, vector<16x128xf32>,
    return
  }
  func.func @transform_0(%arg0: i32) -> (i32, i32) {
    %c0_i32 = arith.constant 0 : i32
    %c0_i32_0 = arith.constant 0 : i32
    return %arg0, %c0_i32 : i32, i32
  }
  func.func @transform_1(%arg0: i32) -> (i32, i32) {
    %c0_i32 = arith.constant 0 : i32
    %c0_i32_0 = arith.constant 0 : i32
    %c0_i32_1 = arith.constant 0 : i32
    return %c0_i32, %c0_i32_0 : i32, i32
  }
  func.func @transform_2(%arg0: i32) -> (i32, i32) {
    %c0_i32 = arith.constant 0 : i32
    %c0_i32_0 = arith.constant 0 : i32
    %c0_i32_1 = arith.constant 0 : i32
    return %c0_i32, %c0_i32_0 : i32, i32
  }
  func.func @transform_3(%arg0: i32) -> (i32, i32) {
    %c0_i32 = arith.constant 0 : i32
    %c0_i32_0 = arith.constant 0 : i32
    return %arg0, %c0_i32 : i32, i32
  }
}

module attributes {stable_mosaic.version = 11 : i64} {
  func.func @_onehot_hi_lo_kernel(%arg0: i32, %arg1: memref<16x1xi32, #tpu.memory_space<vmem>>, %arg2: memref<64x128xbf16, #tpu.memory_space<vmem>>, %arg3: memref<64x128xbf16, #tpu.memory_space<vmem>>, %arg4: memref<16x128xf32, #tpu.memory_space<vmem>>) attributes {dimension_semantics = [#tpu.dimension_semantics<parallel>], iteration_bounds = array<i64: 1>, scalar_prefetch = 0 : i64, scratch_operands = 0 : i64, tpu.core_type = #tpu.core_type<tc>, window_params = [{transform_indices = @transform_0, window_bounds = array<i64: 16, 1>}, {pipeline_mode = #tpu.pipeline_mode<synchronous>, transform_indices = @transform_1, window_bounds = array<i64: 64, 128>}, {pipeline_mode = #tpu.pipeline_mode<synchronous>, transform_indices = @transform_2, window_bounds = array<i64: 64, 128>}, {transform_indices = @transform_3, window_bounds = array<i64: 16, 128>}]} {
    %c0 = arith.constant 0 : index
    %c0_0 = arith.constant 0 : index
    %0 = vector.load %arg1[%c0, %c0_0] : memref<16x1xi32, #tpu.memory_space<vmem>>, vector<16x1xi32>
    %c0_i32 = arith.constant 0 : i32
    %c63_i32 = arith.constant 63 : i32
    %1 = vector.broadcast %c0_i32 : i32 to vector<16x1xi32>
    %2 = arith.maxsi %1, %0 : vector<16x1xi32>
    %3 = vector.broadcast %c63_i32 : i32 to vector<16x1xi32>
    %4 = arith.minsi %3, %2 : vector<16x1xi32>
    %5 = tpu.iota {dimensions = array<i32: 1>} : vector<16x64xi32>
    %6 = vector.broadcast %4 : vector<16x1xi32> to vector<16x64xi32>
    %7 = arith.cmpi eq, %6, %5 : vector<16x64xi32>
    %8 = arith.extui %7 : vector<16x64xi1> to vector<16x64xi32>
    %9 = arith.sitofp %8 : vector<16x64xi32> to vector<16x64xf32>
    %10 = arith.truncf %9 : vector<16x64xf32> to vector<16x64xbf16>
    %c0_1 = arith.constant 0 : index
    %c0_2 = arith.constant 0 : index
    %11 = vector.load %arg2[%c0_1, %c0_2] : memref<64x128xbf16, #tpu.memory_space<vmem>>, vector<64x128xbf16>
    %cst = arith.constant dense<0.000000e+00> : vector<16x128xf32>
    %12 = tpu.matmul %10, %11, %cst {dimension_numbers = #tpu.dot_dimension_numbers<[1], [0], [0], [1], [0, 0, 1, 1], [], []>} : vector<16x64xbf16>, vector<64x128xbf16>, vector<16x128xf32> -> vector<16x128xf32>
    %c0_3 = arith.constant 0 : index
    %c0_4 = arith.constant 0 : index
    %13 = vector.load %arg3[%c0_3, %c0_4] : memref<64x128xbf16, #tpu.memory_space<vmem>>, vector<64x128xbf16>
    %cst_5 = arith.constant dense<0.000000e+00> : vector<16x128xf32>
    %14 = tpu.matmul %10, %13, %cst_5 {dimension_numbers = #tpu.dot_dimension_numbers<[1], [0], [0], [1], [0, 0, 1, 1], [], []>} : vector<16x64xbf16>, vector<64x128xbf16>, vector<16x128xf32> -> vector<16x128xf32>
    %15 = arith.addf %12, %14 : vector<16x128xf32>
    %cst_6 = arith.constant 11.3137083 : f32
    %16 = vector.broadcast %cst_6 : f32 to vector<16x128xf32>
    %17 = arith.mulf %15, %16 : vector<16x128xf32>
    %c0_7 = arith.constant 0 : index
    %c0_8 = arith.constant 0 : index
    %18 = vector.load %arg4[%c0_7, %c0_8] : memref<16x128xf32, #tpu.memory_space<vmem>>, vector<16x128xf32>
    tpu.vector_store %arg4[%c0_7, %c0_8], %17 {strides = array<i32>} : memref<16x128xf32, #tpu.memory_space<vmem>>, vector<16x128xf32>,
    return
  }
  func.func @transform_0(%arg0: i32) -> (i32, i32) {
    %c0_i32 = arith.constant 0 : i32
    %c0_i32_0 = arith.constant 0 : i32
    return %arg0, %c0_i32 : i32, i32
  }
  func.func @transform_1(%arg0: i32) -> (i32, i32) {
    %c0_i32 = arith.constant 0 : i32
    %c0_i32_0 = arith.constant 0 : i32
    %c0_i32_1 = arith.constant 0 : i32
    return %c0_i32, %c0_i32_0 : i32, i32
  }
  func.func @transform_2(%arg0: i32) -> (i32, i32) {
    %c0_i32 = arith.constant 0 : i32
    %c0_i32_0 = arith.constant 0 : i32
    %c0_i32_1 = arith.constant 0 : i32
    return %c0_i32, %c0_i32_0 : i32, i32
  }
  func.func @transform_3(%arg0: i32) -> (i32, i32) {
    %c0_i32 = arith.constant 0 : i32
    %c0_i32_0 = arith.constant 0 : i32
    return %arg0, %c0_i32 : i32, i32
  }
}

</mosaic_0001>

<bundles_post_ra>
// kernel: tpu_custom_call.1
= control target key start
LH: loop header
LB: loop body
LE: loop exit
PB: predicated region body
PF: predicated region fallthrough
CT: control target
= control target key end

     0   :  { %8 = vsyncpa [#allocation3], 0  ;;  %s369_s0 = inlined_call_operand.vmem [shape: s32[16,1], index: 0, kind: input, shape index: {}]   ;;  %s370_s1 = inlined_call_operand.hbm [shape: bf16[64,128], index: 1, kind: input, shape index: {}]   ;;  %s371_s2 = inlined_call_operand.hbm [shape: bf16[64,128], index: 2, kind: input, shape index: {}]   ;;  %s372_s3 = inlined_call_operand.hbm [shape: f32[16,128], index: 3, kind: output, shape index: {}]  }
   0x1   :  { %9 = vsyncpa [#allocation6], 0 }
   0x2   :  { %10 = vsyncpa [#allocation4], 0  ;;  %s17_s14 = sshll.u32 %s370_s1, 4  ;;  %s325_s15 = smov [#allocation2]   ;;  %s18_s14 = int_to_ptr.hbm [resolvable:$true] %s17_s14 }
   0x3   :  { %s19_s16 = sshll.u32 %s325_s15, 4  ;;  %s30_s19 = sshll.u32 %s371_s2, 4  ;;  %s20_s16 = int_to_ptr.vmem [resolvable:$true] %s19_s16  ;;  %s31_s19 = int_to_ptr.hbm [resolvable:$true] %s30_s19 }
   0x4   :  { %s326_s20 = smov 64   ;;  %s327_s21 = smov 4  }
   0x5   :  { %25 = dma.hbm_to_vmem [thread:$0]  %s18_s14, 512, %s20_s16, [#allocation3], %s326_s20, %s326_s20, %s327_s21  }
   0x6   :  { %s328_s22 = smov [#allocation5]  }
   0x7   :  { %s32_s23 = sshll.u32 %s328_s22, 4  ;;  %s33_s23 = int_to_ptr.vmem [resolvable:$true] %s32_s23 }
   0x8   :  { %38 = dma.hbm_to_vmem [thread:$0]  %s31_s19, 512, %s33_s23, [#allocation6], %s326_s20, %s326_s20, %s327_s21  }
   0x9   :  { %319 = dma.done.wait [#allocation3], 512  }
   0xa   :  { %320 = vsyncadd [#allocation3], 4294966784 }
   0xb   :  { %321 = dma.done.wait [#allocation6], 512  }
   0xc   :  { %322 = vsyncadd [#allocation6], 4294966784  ;;  %v329_v0 = vmov 0   ;;  %v48_v1 = vld [vmem:[%s369_s0] sm:$0xff]  ;;  %v49_v2 = vld [vmem:[%s369_s0 + $0x8] sm:$0xff]  ;;  %v58_v15 = vlaneseq  ;;  %v330_v19 = vmov 0.0  }
   0xd   :  { %246 = vset.pattern.permute.xlu0 %v329_v0  ;;  %v236_v3 = vld [vmem:[#allocation5 + $0x18] sm:$0xff]  ;;  %vm50_vm0 = vcmp.gt.s32.totalorder %v48_v1, 0  ;;  %vm52_vm1 = vcmp.gt.s32.totalorder %v49_v2, 0  ;;  %v235_v9 = vld [vmem:[#allocation5 + $0x10] sm:$0xff]  ;;  %v234_v11 = vld [vmem:[#allocation5 + $0x8] sm:$0xff]  ;;  %vm113_vm6 = vcmask 523264  }
   0xe   :  { %v232_v4 = vld [vmem:[#allocation2 + $0x18] sm:$0xff]  ;;  %v51_v5 = vsel %vm50_vm0, %v48_v1, 0  ;;  %121 = vmatpush.bf16.msra.mxu0 %v236_v3  ;;  %v53_v7 = vsel %vm52_vm1, %v49_v2, 0  ;;  %v231_v10 = vld [vmem:[#allocation2 + $0x10] sm:$0xff]  ;;  %v230_v12 = vld [vmem:[#allocation2 + $0x8] sm:$0xff]  ;;  %v59_v17 = vand.u32 127, %v58_v15 }
   0xf   :  { %vm54_vm2 = vcmp.lt.s32.totalorder %v51_v5, 63  ;;  %159 = vmatpush.bf16.msra.mxu1 %v232_v4  ;;  %vm56_vm3 = vcmp.lt.s32.totalorder %v53_v7, 63  ;;  %v233_v13 = vld [vmem:[#allocation5] sm:$0xff]  ;;  %s331_s0 = smov [#allocation7]   ;;  %s179_s29 = sshll.u32 %s372_s3, 4  ;;  %s180_s29 = int_to_ptr.hbm [resolvable:$true] %s179_s29 }
  0x10   :  { %v55_v6 = vsel %vm54_vm2, %v51_v5, 63  ;;  %v57_v8 = vsel %vm56_vm3, %v53_v7, 63  ;;  %v229_v14 = vld [vmem:[#allocation2] sm:$0xff]  ;;  %s177_s26 = sshll.u32 %s331_s0, 4  ;;  %s332_s30 = smov 128   ;;  %s178_s26 = int_to_ptr.vmem [resolvable:$true] %s177_s26 }
  0x11   :  { %61 = vperm.xlu0 %246, %v55_v6   ;;  %s333_s4 = smov 8  }
  0x12   :  { %122 = vmatpush.bf16.msra.mxu0 %v235_v9 }
  0x13   :  { %160 = vmatpush.bf16.msra.mxu1 %v231_v10 }
  0x16   :  { %123 = vmatpush.bf16.msra.mxu0 %v234_v11 }
  0x17   :  { %161 = vmatpush.bf16.msra.mxu1 %v230_v12 }
  0x19   :  { %64 = vperm.xlu0 %246, %v57_v8  }
  0x1a   :  { %124 = vmatpush.bf16.msra.mxu0 %v233_v13 }
  0x1b   :  { %162 = vmatpush.bf16.msra.mxu1 %v229_v14 }
  0x83   :  { %v62_v16 = vpop.permute.xlu0 %61 }
  0x84   :  { %vm66_vm4 = vcmp.eq.s32.totalorder %v62_v16, %v59_v17 }
  0x85   :  { %v193_v20 = vsel %vm66_vm4, 1.0, %v330_v19 }
  0x8b   :  { %v65_v18 = vpop.permute.xlu0 %64 }
  0x8c   :  { %vm67_vm5 = vcmp.eq.s32.totalorder %v65_v18, %v59_v17 }
  0x8d   :  { %v194_v21 = vsel %vm67_vm5, 1.0, %v330_v19 }
  0x8e   :  { %v72_v22 = vpack.c.bf16 %v194_v21, %v193_v20 }
  0x90   :  { %211 = vmatmul.msk.bf16.vlgmr.msra.gmra.mxu0 %vm113_vm6, %v72_v22  ;;  %228 = vmatmul.msk.bf16.vlgmr.msra.gmra.mxu1 %vm113_vm6, %v72_v22 }
 0x10d   :  { %v126_v23 = vpop.f32.mrf.mxu0  ;;  %v164_v24 = vpop.f32.mrf.mxu1 }
 0x10e   :  { %v165_v25 = vadd.f32 %v164_v24, %v126_v23 }
 0x110   :  { %v169_v26 = vmul.f32 11.313708, %v165_v25 }
 0x112   :  { %171 = vst [vmem:[#allocation7] sm:$0xff] %v169_v26 }
 0x115   :  { %v128_v27 = vpop.f32.mrf.mxu0  ;;  %v166_v28 = vpop.f32.mrf.mxu1 }
 0x116   :  { %v167_v29 = vadd.f32 %v166_v28, %v128_v27 }
 0x118   :  { %v170_v30 = vmul.f32 11.313708, %v167_v29 }
 0x11a   :  { %172 = vst [vmem:[#allocation7 + $0x8] sm:$0xff] %v170_v30 }
 0x11b   :  { %185 = dma.vmem_to_hbm [thread:$0]  %s178_s26, 256, %s180_s29, [#allocation4], %s332_s30, %s332_s30, %s333_s4  }
 0x11c   :  { %323 = dma.done.wait [#allocation4], 256  }
 0x11d   :  { %324 = vsyncadd [#allocation4], 4294967040 }
 0x11e   :  { %190 = vsyncpa [#allocation3], 1 }
 0x11f   :  { %191 = vsyncpa [#allocation6], 1 }
 0x120   :  { %192 = vsyncpa [#allocation4], 1 }

// kernel: tpu_custom_call.1
= control target key start
LH: loop header
LB: loop body
LE: loop exit
PB: predicated region body
PF: predicated region fallthrough
CT: control target
= control target key end

     0   :  { %8 = vsyncpa [#allocation3], 0  ;;  %s369_s0 = inlined_call_operand.vmem [shape: s32[16,1], index: 0, kind: input, shape index: {}]   ;;  %s370_s1 = inlined_call_operand.hbm [shape: bf16[64,128], index: 1, kind: input, shape index: {}]   ;;  %s371_s2 = inlined_call_operand.hbm [shape: bf16[64,128], index: 2, kind: input, shape index: {}]   ;;  %s372_s3 = inlined_call_operand.hbm [shape: f32[16,128], index: 3, kind: output, shape index: {}]  }
   0x1   :  { %9 = vsyncpa [#allocation6], 0 }
   0x2   :  { %10 = vsyncpa [#allocation4], 0  ;;  %s17_s14 = sshll.u32 %s370_s1, 4  ;;  %s325_s15 = smov [#allocation2]   ;;  %s18_s14 = int_to_ptr.hbm [resolvable:$true] %s17_s14 }
   0x3   :  { %s19_s16 = sshll.u32 %s325_s15, 4  ;;  %s30_s19 = sshll.u32 %s371_s2, 4  ;;  %s20_s16 = int_to_ptr.vmem [resolvable:$true] %s19_s16  ;;  %s31_s19 = int_to_ptr.hbm [resolvable:$true] %s30_s19 }
   0x4   :  { %s326_s20 = smov 64   ;;  %s327_s21 = smov 4  }
   0x5   :  { %25 = dma.hbm_to_vmem [thread:$0]  %s18_s14, 512, %s20_s16, [#allocation3], %s326_s20, %s326_s20, %s327_s21  }
   0x6   :  { %s328_s22 = smov [#allocation5]  }
   0x7   :  { %s32_s23 = sshll.u32 %s328_s22, 4  ;;  %s33_s23 = int_to_ptr.vmem [resolvable:$true] %s32_s23 }
   0x8   :  { %38 = dma.hbm_to_vmem [thread:$0]  %s31_s19, 512, %s33_s23, [#allocation6], %s326_s20, %s326_s20, %s327_s21  }
   0x9   :  { %319 = dma.done.wait [#allocation3], 512  }
   0xa   :  { %320 = vsyncadd [#allocation3], 4294966784 }
   0xb   :  { %321 = dma.done.wait [#allocation6], 512  }
   0xc   :  { %322 = vsyncadd [#allocation6], 4294966784  ;;  %v329_v0 = vmov 0   ;;  %v48_v1 = vld [vmem:[%s369_s0] sm:$0xff]  ;;  %v49_v2 = vld [vmem:[%s369_s0 + $0x8] sm:$0xff]  ;;  %v58_v15 = vlaneseq  ;;  %v330_v19 = vmov 0.0  }
   0xd   :  { %246 = vset.pattern.permute.xlu0 %v329_v0  ;;  %v236_v3 = vld [vmem:[#allocation5 + $0x18] sm:$0xff]  ;;  %vm50_vm0 = vcmp.gt.s32.totalorder %v48_v1, 0  ;;  %vm52_vm1 = vcmp.gt.s32.totalorder %v49_v2, 0  ;;  %v235_v9 = vld [vmem:[#allocation5 + $0x10] sm:$0xff]  ;;  %v234_v11 = vld [vmem:[#allocation5 + $0x8] sm:$0xff]  ;;  %vm113_vm6 = vcmask 523264  }
   0xe   :  { %v232_v4 = vld [vmem:[#allocation2 + $0x18] sm:$0xff]  ;;  %v51_v5 = vsel %vm50_vm0, %v48_v1, 0  ;;  %121 = vmatpush.bf16.msra.mxu0 %v236_v3  ;;  %v53_v7 = vsel %vm52_vm1, %v49_v2, 0  ;;  %v231_v10 = vld [vmem:[#allocation2 + $0x10] sm:$0xff]  ;;  %v230_v12 = vld [vmem:[#allocation2 + $0x8] sm:$0xff]  ;;  %v59_v17 = vand.u32 127, %v58_v15 }
   0xf   :  { %vm54_vm2 = vcmp.lt.s32.totalorder %v51_v5, 63  ;;  %159 = vmatpush.bf16.msra.mxu1 %v232_v4  ;;  %vm56_vm3 = vcmp.lt.s32.totalorder %v53_v7, 63  ;;  %v233_v13 = vld [vmem:[#allocation5] sm:$0xff]  ;;  %s331_s0 = smov [#allocation7]   ;;  %s179_s29 = sshll.u32 %s372_s3, 4  ;;  %s180_s29 = int_to_ptr.hbm [resolvable:$true] %s179_s29 }
  0x10   :  { %v55_v6 = vsel %vm54_vm2, %v51_v5, 63  ;;  %v57_v8 = vsel %vm56_vm3, %v53_v7, 63  ;;  %v229_v14 = vld [vmem:[#allocation2] sm:$0xff]  ;;  %s177_s26 = sshll.u32 %s331_s0, 4  ;;  %s332_s30 = smov 128   ;;  %s178_s26 = int_to_ptr.vmem [resolvable:$true] %s177_s26 }
  0x11   :  { %61 = vperm.xlu0 %246, %v55_v6   ;;  %s333_s4 = smov 8  }
  0x12   :  { %122 = vmatpush.bf16.msra.mxu0 %v235_v9 }
  0x13   :  { %160 = vmatpush.bf16.msra.mxu1 %v231_v10 }
  0x16   :  { %123 = vmatpush.bf16.msra.mxu0 %v234_v11 }
  0x17   :  { %161 = vmatpush.bf16.msra.mxu1 %v230_v12 }
  0x19   :  { %64 = vperm.xlu0 %246, %v57_v8  }
  0x1a   :  { %124 = vmatpush.bf16.msra.mxu0 %v233_v13 }
  0x1b   :  { %162 = vmatpush.bf16.msra.mxu1 %v229_v14 }
  0x83   :  { %v62_v16 = vpop.permute.xlu0 %61 }
  0x84   :  { %vm66_vm4 = vcmp.eq.s32.totalorder %v62_v16, %v59_v17 }
  0x85   :  { %v193_v20 = vsel %vm66_vm4, 1.0, %v330_v19 }
  0x8b   :  { %v65_v18 = vpop.permute.xlu0 %64 }
  0x8c   :  { %vm67_vm5 = vcmp.eq.s32.totalorder %v65_v18, %v59_v17 }
  0x8d   :  { %v194_v21 = vsel %vm67_vm5, 1.0, %v330_v19 }
  0x8e   :  { %v72_v22 = vpack.c.bf16 %v194_v21, %v193_v20 }
  0x90   :  { %211 = vmatmul.msk.bf16.vlgmr.msra.gmra.mxu0 %vm113_vm6, %v72_v22  ;;  %228 = vmatmul.msk.bf16.vlgmr.msra.gmra.mxu1 %vm113_vm6, %v72_v22 }
 0x10d   :  { %v126_v23 = vpop.f32.mrf.mxu0  ;;  %v164_v24 = vpop.f32.mrf.mxu1 }
 0x10e   :  { %v165_v25 = vadd.f32 %v164_v24, %v126_v23 }
 0x110   :  { %v169_v26 = vmul.f32 11.313708, %v165_v25 }
 0x112   :  { %171 = vst [vmem:[#allocation7] sm:$0xff] %v169_v26 }
 0x115   :  { %v128_v27 = vpop.f32.mrf.mxu0  ;;  %v166_v28 = vpop.f32.mrf.mxu1 }
 0x116   :  { %v167_v29 = vadd.f32 %v166_v28, %v128_v27 }
 0x118   :  { %v170_v30 = vmul.f32 11.313708, %v167_v29 }
 0x11a   :  { %172 = vst [vmem:[#allocation7 + $0x8] sm:$0xff] %v170_v30 }
 0x11b   :  { %185 = dma.vmem_to_hbm [thread:$0]  %s178_s26, 256, %s180_s29, [#allocation4], %s332_s30, %s332_s30, %s333_s4  }
 0x11c   :  { %323 = dma.done.wait [#allocation4], 256  }
 0x11d   :  { %324 = vsyncadd [#allocation4], 4294967040 }
 0x11e   :  { %190 = vsyncpa [#allocation3], 1 }
 0x11f   :  { %191 = vsyncpa [#allocation6], 1 }
 0x120   :  { %192 = vsyncpa [#allocation4], 1 }

</bundles_post_ra>
